<compile_context>
chip_gen: v6e
topology: v6e:2x2x1
jax: 0.10.0
libtpu: 0.0.40
codegen_flags: <defaults>
</compile_context>

<pallas_src>
import jax
import jax.numpy as jnp
from jax.experimental import pallas as pl
from jax.experimental.pallas import tpu as pltpu

HIDDEN = 256            # trunk / stream hidden width (fixed by the module)
H2 = 2 * HIDDEN         # fused value|advantage hidden width


def _round_up(n, m):
    return ((n + m - 1) // m) * m


# --------------------------------------------------------------------------- #
# Kernel
# --------------------------------------------------------------------------- #
def _dueling_kernel(x_ref, w1_ref, b1_ref, wh_ref, bh_ref, wo_ref, bo_ref,
                    o_ref, h_scr, hva_scr):
    cdt = h_scr.dtype

    # Shared trunk: relu(fc1(x)).  f32 accumulation, cast to compute dtype for
    # the next MXU stage; staged in VMEM scratch to bound vreg pressure.
    h = jnp.dot(x_ref[...], w1_ref[...], preferred_element_type=jnp.float32)
    h_scr[...] = jnp.maximum(h + b1_ref[...], 0.0).astype(cdt)

    # Fused value|advantage hidden streams: relu(h @ [wv1|wa1] + [bv1|ba1]).
    hva = jnp.dot(h_scr[...], wh_ref[...], preferred_element_type=jnp.float32)
    hva_scr[...] = jnp.maximum(hva + bh_ref[...], 0.0).astype(cdt)

    # Fused output stage.  wo stacks the lane-replicated value head on top of
    # the pre-centered (mean-subtracted) advantage head, so this single matmul
    # directly produces Q = V + (A - mean(A)) -- no in-kernel cross-lane reduce.
    q = jnp.dot(hva_scr[...], wo_ref[...], preferred_element_type=jnp.float32)
    o_ref[...] = (q + bo_ref[...]).astype(o_ref.dtype)


# --------------------------------------------------------------------------- #
# One-time weight preparation (do NOT call per forward)
# --------------------------------------------------------------------------- #
def prepare_params(params, *, compute_dtype=jnp.float32):
    """Transpose / fuse / pre-center / pad / cast the PyTorch-layout weights."""
    A = params["advantage_w"].shape[0]
    AP = _round_up(A, 128)          # lane-dense padded action dim (exactly 128 for small A)
    cdt = compute_dtype

    # Trunk.
    w1 = params["fc1_w"].T                                        # [S, 256]
    b1 = params["fc1_b"].reshape(1, -1)                           # [1, 256]

    # Fused hidden streams: columns 0..255 = value stream, 256..511 = advantage.
    wh = jnp.concatenate([params["fc_value_w"].T,
                          params["fc_advantage_w"].T], axis=1)    # [256, 512]
    bh = jnp.concatenate([params["fc_value_b"],
                          params["fc_advantage_b"]]).reshape(1, -1)  # [1, 512]

    # Output stage.
    # Value head [256,1] replicated across all AP lanes -> V broadcasts for free.
    wv2_rep = jnp.tile(params["value_w"].T, (1, AP))              # [256, AP]
    bv2_rep = jnp.tile(params["value_b"].reshape(1, 1), (1, AP))  # [1, AP]

    # Advantage head pre-centered over the A real actions, zero-padded to AP.
    wa2 = params["advantage_w"].T                                 # [256, A]
    wa2_c = wa2 - jnp.mean(wa2, axis=1, keepdims=True)
    wa2_c = jnp.zeros((HIDDEN, AP), wa2.dtype).at[:, :A].set(wa2_c)
    ba2_c = params["advantage_b"] - jnp.mean(params["advantage_b"])
    ba2_c = jnp.zeros((1, AP), ba2_c.dtype).at[0, :A].set(ba2_c)

    wo = jnp.concatenate([wv2_rep, wa2_c], axis=0)                # [512, AP]
    bo = bv2_rep + ba2_c                                          # [1, AP]

    cast = lambda a: a.astype(cdt)
    return {
        "action_size": A, "padded_actions": AP, "compute_dtype": cdt,
        "w1": cast(w1), "b1": cast(b1),
        "wh": cast(wh), "bh": cast(bh),
        "wo": cast(wo), "bo": cast(bo),
    }


def _choose_batch_tile(B, batch_tile):
    full = _round_up(B, 8)
    if full <= batch_tile:
        # Whole batch fits one tile.  For large batches split into two parallel
        # grid steps so v7x's second TensorCore is used; tiny batches stay 1-step.
        if B >= 512:
            return _round_up((B + 1) // 2, 8)
        return full
    return batch_tile


# --------------------------------------------------------------------------- #
# Forward wrapper
# --------------------------------------------------------------------------- #
def dueling_qnetwork_forward(x, prepared, *, batch_tile=1024,
                             out_dtype=jnp.float32):
    """x: [B, state_size].  prepared: output of prepare_params()."""
    B, S = x.shape
    A = prepared["action_size"]
    AP = prepared["padded_actions"]
    cdt = prepared["compute_dtype"]

    bt = _choose_batch_tile(B, batch_tile)
    B_pad = _round_up(B, bt)
    xp = x.astype(cdt)
    if B_pad != B:
        xp = jnp.pad(xp, ((0, B_pad - B), (0, 0)))

    grid = (B_pad // bt,)

    weights = (prepared["w1"], prepared["b1"],
               prepared["wh"], prepared["bh"],
               prepared["wo"], prepared["bo"])

    def const_spec(arr):
        # Grid-invariant block: DMA'd once, single-buffered.
        return pl.BlockSpec(arr.shape, lambda i: (0, 0),
                            pipeline_mode=pl.Buffered(1))

    itemsize = lambda dt: jnp.dtype(dt).itemsize
    flops = 2 * B_pad * (S * HIDDEN + HIDDEN * H2 + H2 * AP)
    bytes_accessed = (sum(int(w.size) * itemsize(w.dtype) for w in weights)
                      + B_pad * S * itemsize(cdt)
                      + B_pad * AP * itemsize(out_dtype))
    cost = pl.CostEstimate(flops=flops, transcendentals=0,
                           bytes_accessed=bytes_accessed)

    out = pl.pallas_call(
        _dueling_kernel,
        out_shape=jax.ShapeDtypeStruct((B_pad, AP), out_dtype),
        grid=grid,
        in_specs=[pl.BlockSpec((bt, S), lambda i: (i, 0))]
                 + [const_spec(w) for w in weights],
        out_specs=pl.BlockSpec((bt, AP), lambda i: (i, 0)),
        scratch_shapes=[pltpu.VMEM((bt, HIDDEN), cdt),
                        pltpu.VMEM((bt, H2), cdt)],
        compiler_params=pltpu.CompilerParams(
            dimension_semantics=("parallel",),
        ),
        cost_estimate=cost,
    )(xp, *weights)

    return out[:B, :A]


# --------------------------------------------------------------------------- #
# Synthetic init + pure-JAX reference (matches the PyTorch module exactly)
# --------------------------------------------------------------------------- #
def init_params(key, state_size, action_size):
    ks = jax.random.split(key, 10)

    def lin(kw, kb, fan_in, fan_out):
        bound = 1.0 / (fan_in ** 0.5)
        w = jax.random.uniform(kw, (fan_out, fan_in), jnp.float32, -bound, bound)
        b = jax.random.uniform(kb, (fan_out,), jnp.float32, -bound, bound)
        return w, b

    fc1_w, fc1_b = lin(ks[0], ks[1], state_size, HIDDEN)
    fc_value_w, fc_value_b = lin(ks[2], ks[3], HIDDEN, HIDDEN)
    fc_advantage_w, fc_advantage_b = lin(ks[4], ks[5], HIDDEN, HIDDEN)
    value_w, value_b = lin(ks[6], ks[7], HIDDEN, 1)
    advantage_w, advantage_b = lin(ks[8], ks[9], HIDDEN, action_size)
    return {
        "fc1_w": fc1_w, "fc1_b": fc1_b,
        "fc_value_w": fc_value_w, "fc_value_b": fc_value_b,
        "fc_advantage_w": fc_advantage_w, "fc_advantage_b": fc_advantage_b,
        "value_w": value_w, "value_b": value_b,
        "advantage_w": advantage_w, "advantage_b": advantage_b,
    }


def reference_forward(x, p):
    h = jnp.maximum(x @ p["fc1_w"].T + p["fc1_b"], 0.0)
    v = jnp.maximum(h @ p["fc_value_w"].T + p["fc_value_b"], 0.0)
    v = v @ p["value_w"].T + p["value_b"]
    a = jnp.maximum(h @ p["fc_advantage_w"].T + p["fc_advantage_b"], 0.0)
    a = a @ p["advantage_w"].T + p["advantage_b"]
    return v + (a - a.mean(axis=1, keepdims=True))


if __name__ == "__main__":
    key = jax.random.PRNGKey(0)
    k_param, k_x, k_x2 = jax.random.split(key, 3)

    batch, state_size, action_size = 8, 8, 4
    params = init_params(k_param, state_size, action_size)
    x = jax.random.normal(k_x, (batch, state_size), jnp.float32)
    ref = reference_forward(x, params)

    # --- float32 path (exact match to reference) ---------------------------
    prepared_f32 = prepare_params(params, compute_dtype=jnp.float32)
    out = jax.block_until_ready(dueling_qnetwork_forward(x, prepared_f32))
    assert out.shape == (batch, action_size)
    assert jnp.allclose(out, ref, atol=1e-4, rtol=1e-4), "f32 mismatch vs reference"

    # --- non-divisible batch / multi-step grid path -------------------------
    x2 = jax.random.normal(k_x2, (10, state_size), jnp.float32)
    ref2 = reference_forward(x2, params)
    out2 = jax.block_until_ready(
        dueling_qnetwork_forward(x2, prepared_f32, batch_tile=8))
    assert out2.shape == (10, action_size)
    assert jnp.allclose(out2, ref2, atol=1e-4, rtol=1e-4), "padded-batch mismatch"

    # --- bfloat16 operand path (v6e/v7x fast path; f32 accumulation) --------
    prepared_bf16 = prepare_params(params, compute_dtype=jnp.bfloat16)
    out_bf16 = jax.block_until_ready(dueling_qnetwork_forward(x, prepared_bf16))
    assert out_bf16.shape == (batch, action_size)
    assert jnp.allclose(out_bf16, ref, atol=5e-2, rtol=5e-2), "bf16 mismatch vs reference"

    print("KERNEL_OK")
</pallas_src>

<mosaic_0001>
module attributes {stable_mosaic.version = 11 : i64} {
  func.func @_dueling_kernel(%arg0: i32, %arg1: memref<8x8xf32, #tpu.memory_space<vmem>>, %arg2: memref<8x256xf32, #tpu.memory_space<vmem>>, %arg3: memref<1x256xf32, #tpu.memory_space<vmem>>, %arg4: memref<256x512xf32, #tpu.memory_space<vmem>>, %arg5: memref<1x512xf32, #tpu.memory_space<vmem>>, %arg6: memref<512x128xf32, #tpu.memory_space<vmem>>, %arg7: memref<1x128xf32, #tpu.memory_space<vmem>>, %arg8: memref<8x128xf32, #tpu.memory_space<vmem>>, %arg9: memref<8x256xf32, #tpu.memory_space<vmem>>, %arg10: memref<8x512xf32, #tpu.memory_space<vmem>>) attributes {dimension_semantics = [#tpu.dimension_semantics<parallel>], iteration_bounds = array<i64: 1>, scalar_prefetch = 0 : i64, scratch_operands = 2 : i64, tpu.core_type = #tpu.core_type<tc>, window_params = [{transform_indices = @transform_0, window_bounds = array<i64: 8, 8>}, {pipeline_mode = #tpu.pipeline_mode<synchronous>, transform_indices = @transform_1, window_bounds = array<i64: 8, 256>}, {pipeline_mode = #tpu.pipeline_mode<synchronous>, transform_indices = @transform_2, window_bounds = array<i64: 1, 256>}, {pipeline_mode = #tpu.pipeline_mode<synchronous>, transform_indices = @transform_3, window_bounds = array<i64: 256, 512>}, {pipeline_mode = #tpu.pipeline_mode<synchronous>, transform_indices = @transform_4, window_bounds = array<i64: 1, 512>}, {pipeline_mode = #tpu.pipeline_mode<synchronous>, transform_indices = @transform_5, window_bounds = array<i64: 512, 128>}, {pipeline_mode = #tpu.pipeline_mode<synchronous>, transform_indices = @transform_6, window_bounds = array<i64: 1, 128>}, {transform_indices = @transform_7, window_bounds = array<i64: 8, 128>}]} {
    %c0 = arith.constant 0 : index
    %c0_0 = arith.constant 0 : index
    %0 = vector.load %arg1[%c0, %c0_0] : memref<8x8xf32, #tpu.memory_space<vmem>>, vector<8x8xf32>
    %c0_1 = arith.constant 0 : index
    %c0_2 = arith.constant 0 : index
    %1 = vector.load %arg2[%c0_1, %c0_2] : memref<8x256xf32, #tpu.memory_space<vmem>>, vector<8x256xf32>
    %cst = arith.constant dense<0.000000e+00> : vector<8x256xf32>
    %2 = tpu.matmul %0, %1, %cst {dimension_numbers = #tpu.dot_dimension_numbers<[1], [0], [0], [1], [0, 0, 1, 1], [], []>} : vector<8x8xf32>, vector<8x256xf32>, vector<8x256xf32> -> vector<8x256xf32>
    %c0_3 = arith.constant 0 : index
    %c0_4 = arith.constant 0 : index
    %3 = vector.load %arg3[%c0_3, %c0_4] : memref<1x256xf32, #tpu.memory_space<vmem>>, vector<1x256xf32>
    %4 = vector.broadcast %3 : vector<1x256xf32> to vector<8x256xf32>
    %5 = arith.addf %2, %4 : vector<8x256xf32>
    %cst_5 = arith.constant 0.000000e+00 : f32
    %6 = vector.broadcast %cst_5 : f32 to vector<8x256xf32>
    %7 = arith.maximumf %5, %6 : vector<8x256xf32>
    %c0_6 = arith.constant 0 : index
    %c0_7 = arith.constant 0 : index
    %8 = vector.load %arg9[%c0_6, %c0_7] : memref<8x256xf32, #tpu.memory_space<vmem>>, vector<8x256xf32>
    tpu.vector_store %arg9[%c0_6, %c0_7], %7 {strides = array<i32>} : memref<8x256xf32, #tpu.memory_space<vmem>>, vector<8x256xf32>,
    %c0_8 = arith.constant 0 : index
    %c0_9 = arith.constant 0 : index
    %9 = vector.load %arg9[%c0_8, %c0_9] : memref<8x256xf32, #tpu.memory_space<vmem>>, vector<8x256xf32>
    %c0_10 = arith.constant 0 : index
    %c0_11 = arith.constant 0 : index
    %10 = vector.load %arg4[%c0_10, %c0_11] : memref<256x512xf32, #tpu.memory_space<vmem>>, vector<256x512xf32>
    %cst_12 = arith.constant dense<0.000000e+00> : vector<8x512xf32>
    %11 = tpu.matmul %9, %10, %cst_12 {dimension_numbers = #tpu.dot_dimension_numbers<[1], [0], [0], [1], [0, 0, 1, 1], [], []>} : vector<8x256xf32>, vector<256x512xf32>, vector<8x512xf32> -> vector<8x512xf32>
    %c0_13 = arith.constant 0 : index
    %c0_14 = arith.constant 0 : index
    %12 = vector.load %arg5[%c0_13, %c0_14] : memref<1x512xf32, #tpu.memory_space<vmem>>, vector<1x512xf32>
    %13 = vector.broadcast %12 : vector<1x512xf32> to vector<8x512xf32>
    %14 = arith.addf %11, %13 : vector<8x512xf32>
    %cst_15 = arith.constant 0.000000e+00 : f32
    %15 = vector.broadcast %cst_15 : f32 to vector<8x512xf32>
    %16 = arith.maximumf %14, %15 : vector<8x512xf32>
    %c0_16 = arith.constant 0 : index
    %c0_17 = arith.constant 0 : index
    %17 = vector.load %arg10[%c0_16, %c0_17] : memref<8x512xf32, #tpu.memory_space<vmem>>, vector<8x512xf32>
    tpu.vector_store %arg10[%c0_16, %c0_17], %16 {strides = array<i32>} : memref<8x512xf32, #tpu.memory_space<vmem>>, vector<8x512xf32>,
    %c0_18 = arith.constant 0 : index
    %c0_19 = arith.constant 0 : index
    %18 = vector.load %arg10[%c0_18, %c0_19] : memref<8x512xf32, #tpu.memory_space<vmem>>, vector<8x512xf32>
    %c0_20 = arith.constant 0 : index
    %c0_21 = arith.constant 0 : index
    %19 = vector.load %arg6[%c0_20, %c0_21] : memref<512x128xf32, #tpu.memory_space<vmem>>, vector<512x128xf32>
    %cst_22 = arith.constant dense<0.000000e+00> : vector<8x128xf32>
    %20 = tpu.matmul %18, %19, %cst_22 {dimension_numbers = #tpu.dot_dimension_numbers<[1], [0], [0], [1], [0, 0, 1, 1], [], []>} : vector<8x512xf32>, vector<512x128xf32>, vector<8x128xf32> -> vector<8x128xf32>
    %c0_23 = arith.constant 0 : index
    %c0_24 = arith.constant 0 : index
    %21 = vector.load %arg7[%c0_23, %c0_24] : memref<1x128xf32, #tpu.memory_space<vmem>>, vector<1x128xf32>
    %22 = vector.broadcast %21 : vector<1x128xf32> to vector<8x128xf32>
    %23 = arith.addf %20, %22 : vector<8x128xf32>
    %c0_25 = arith.constant 0 : index
    %c0_26 = arith.constant 0 : index
    %24 = vector.load %arg8[%c0_25, %c0_26] : memref<8x128xf32, #tpu.memory_space<vmem>>, vector<8x128xf32>
    tpu.vector_store %arg8[%c0_25, %c0_26], %23 {strides = array<i32>} : memref<8x128xf32, #tpu.memory_space<vmem>>, vector<8x128xf32>,
    return
  }
  func.func @transform_0(%arg0: i32) -> (i32, i32) {
    %c0_i32 = arith.constant 0 : i32
    %c0_i32_0 = arith.constant 0 : i32
    return %arg0, %c0_i32 : i32, i32
  }
  func.func @transform_1(%arg0: i32) -> (i32, i32) {
    %c0_i32 = arith.constant 0 : i32
    %c0_i32_0 = arith.constant 0 : i32
    %c0_i32_1 = arith.constant 0 : i32
    return %c0_i32, %c0_i32_0 : i32, i32
  }
  func.func @transform_2(%arg0: i32) -> (i32, i32) {
    %c0_i32 = arith.constant 0 : i32
    %c0_i32_0 = arith.constant 0 : i32
    %c0_i32_1 = arith.constant 0 : i32
    return %c0_i32, %c0_i32_0 : i32, i32
  }
  func.func @transform_3(%arg0: i32) -> (i32, i32) {
    %c0_i32 = arith.constant 0 : i32
    %c0_i32_0 = arith.constant 0 : i32
    %c0_i32_1 = arith.constant 0 : i32
    return %c0_i32, %c0_i32_0 : i32, i32
  }
  func.func @transform_4(%arg0: i32) -> (i32, i32) {
    %c0_i32 = arith.constant 0 : i32
    %c0_i32_0 = arith.constant 0 : i32
    %c0_i32_1 = arith.constant 0 : i32
    return %c0_i32, %c0_i32_0 : i32, i32
  }
  func.func @transform_5(%arg0: i32) -> (i32, i32) {
    %c0_i32 = arith.constant 0 : i32
    %c0_i32_0 = arith.constant 0 : i32
    %c0_i32_1 = arith.constant 0 : i32
    return %c0_i32, %c0_i32_0 : i32, i32
  }
  func.func @transform_6(%arg0: i32) -> (i32, i32) {
    %c0_i32 = arith.constant 0 : i32
    %c0_i32_0 = arith.constant 0 : i32
    %c0_i32_1 = arith.constant 0 : i32
    return %c0_i32, %c0_i32_0 : i32, i32
  }
  func.func @transform_7(%arg0: i32) -> (i32, i32) {
    %c0_i32 = arith.constant 0 : i32
    %c0_i32_0 = arith.constant 0 : i32
    return %arg0, %c0_i32 : i32, i32
  }
}

</mosaic_0001>

<bundles_post_ra>
// kernel: tpu_custom_call.1
= control target key start
LH: loop header
LB: loop body
LE: loop exit
PB: predicated region body
PF: predicated region fallthrough
CT: control target
= control target key end

     0   :  { %12 = vsyncpa [#allocation5], 0  ;;  %s985_s0 = inlined_call_operand.hbm [shape: f32[8,8], index: 0, kind: input, shape index: {}]   ;;  %s986_s1 = inlined_call_operand.hbm [shape: f32[8,256], index: 1, kind: input, shape index: {}]   ;;  %s987_s2 = inlined_call_operand.vmem [shape: f32[1,256], index: 2, kind: input, shape index: {}]   ;;  %s988_s3 = inlined_call_operand.hbm [shape: f32[256,512], index: 3, kind: input, shape index: {}]   ;;  %s989_s4 = inlined_call_operand.vmem [shape: f32[1,512], index: 4, kind: input, shape index: {}]   ;;  %s990_s5 = inlined_call_operand.hbm [shape: f32[512,128], index: 5, kind: input, shape index: {}]   ;;  %s991_s6 = inlined_call_operand.vmem [shape: f32[1,128], index: 6, kind: input, shape index: {}]   ;;  %s992_s7 = inlined_call_operand.hbm [shape: f32[8,128], index: 7, kind: output, shape index: {}]  }
   0x1   :  { %13 = vsyncpa [#allocation8], 0 }
   0x2   :  { %14 = vsyncpa [#allocation11], 0 }
   0x3   :  { %15 = vsyncpa [#allocation6], 0  ;;  %s897_s24 = smov [#allocation7]   ;;  %s898_s26 = smov [#allocation4]  }
   0x4   :  { %s32_s25 = sshll.u32 %s897_s24, 4  ;;  %s22_s27 = sshll.u32 %s898_s26, 4  ;;  %s33_s25 = int_to_ptr.vmem [resolvable:$true] %s32_s25  ;;  %s23_s27 = int_to_ptr.vmem [resolvable:$true] %s22_s27 }
   0x5   :  { %s797_s28 = scalar_lea.vmem %s33_s25, 256  ;;  %p802_p1 = scmp.lt.s32.totalorder %s33_s25, %s33_s25 }
   0x6   :  { %p798_p0 = scmp.ne.s32.totalorder %s33_s25, %s797_s28  ;;  %p803_p2 = scmp.lt.s32.totalorder %s797_s28, %s797_s28 }
   0x8   :  { %p804_p3 = por %p803_p2, %p802_p1 }
   0xa   :  { %p805_p4 = pnand %p804_p3, %p798_p0 }
   0xc   :  { %808 = shalt.err (!%p805_p4)
}
   0xd   :  { %35 = dma.hbm_to_vmem [thread:$0]  %s986_s1, 256, %s33_s25, [#allocation8]  }
   0xe   :  { %s817_s8 = scalar_lea.vmem %s23_s27, 128  ;;  %p822_p6 = scmp.lt.s32.totalorder %s23_s27, %s23_s27 }
   0xf   :  { %p818_p5 = scmp.ne.s32.totalorder %s23_s27, %s817_s8  ;;  %p823_p7 = scmp.lt.s32.totalorder %s817_s8, %s817_s8 }
  0x11   :  { %p824_p8 = por %p823_p7, %p822_p6 }
  0x13   :  { %p825_p9 = pnand %p824_p8, %p818_p5 }
  0x15   :  { %828 = shalt.err (!%p825_p9)
}
  0x16   :  { %25 = dma.hbm_to_vmem [thread:$0]  %s985_s0, 128, %s23_s27, [#allocation5]  }
  0x17   :  { %s899_s11 = smov [#allocation9]  }
  0x18   :  { %s43_s12 = sshll.u32 %s899_s11, 4  ;;  %s44_s12 = int_to_ptr.vmem [resolvable:$true] %s43_s12 }
  0x19   :  { %s837_s13 = scalar_lea.vmem %s44_s12, 16384  ;;  %p842_p11 = scmp.lt.s32.totalorder %s44_s12, %s44_s12 }
  0x1a   :  { %p838_p10 = scmp.ne.s32.totalorder %s44_s12, %s837_s13  ;;  %p843_p12 = scmp.lt.s32.totalorder %s837_s13, %s837_s13 }
  0x1c   :  { %p844_p13 = por %p843_p12, %p842_p11 }
  0x1e   :  { %p845_p0 = pnand %p844_p13, %p838_p10 }
  0x20   :  { %848 = shalt.err (!%p845_p0)
}
  0x21   :  { %s900_s1 = smov 512   ;;  %s901_s14 = smov 32  }
  0x22   :  { %49 = dma.hbm_to_vmem [thread:$0]  %s988_s3, 16384, %s44_s12, [#allocation8], %s900_s1, %s900_s1, %s901_s14  }
  0x23   :  { %s902_s17 = smov [#allocation10]  }
  0x24   :  { %s57_s18 = sshll.u32 %s902_s17, 4  ;;  %s58_s18 = int_to_ptr.vmem [resolvable:$true] %s57_s18 }
  0x25   :  { %s857_s0 = scalar_lea.vmem %s58_s18, 8192  ;;  %p862_p2 = scmp.lt.s32.totalorder %s58_s18, %s58_s18 }
  0x26   :  { %p858_p1 = scmp.ne.s32.totalorder %s58_s18, %s857_s0  ;;  %p863_p3 = scmp.lt.s32.totalorder %s857_s0, %s857_s0 }
  0x28   :  { %p864_p4 = por %p863_p3, %p862_p2 }
  0x2a   :  { %p865_p5 = pnand %p864_p4, %p858_p1 }
  0x2c   :  { %868 = shalt.err (!%p865_p5)
}
  0x2d   :  { %s903_s19 = smov 128   ;;  %s904_s20 = smov 8  }
  0x2e   :  { %63 = dma.hbm_to_vmem [thread:$0]  %s990_s5, 8192, %s58_s18, [#allocation11], %s903_s19, %s903_s19, %s904_s20  }
  0x2f   :  { %889 = dma.done.wait [#allocation5], 128  }
  0x30   :  { %890 = vsyncadd [#allocation5], 4294967168 }
  0x31   :  { %891 = dma.done.wait [#allocation8], 16640  }
  0x32   :  { %892 = vsyncadd [#allocation8], 4294950656 }
  0x33   :  { %893 = dma.done.wait [#allocation11], 8192  }
  0x34   :  { %894 = vsyncadd [#allocation11], 4294959104  ;;  %v905_v0 = vmov 0.0   ;;  %v80_v1 = vld [vmem:[#allocation7 + $0x8] sm:$0xff]  ;;  %v79_v2 = vld [vmem:[#allocation7] sm:$0xff]  ;;  %vm93_vm0 = vcmask 64512  }
  0x35   :  { %161 = vmatprep.mubr.f32.mxu0 %v905_v0  ;;  %v78_v3 = vld [vmem:[#allocation4] sm:$0xff]  ;;  %127 = vmatprep.subr.mxu0 %v80_v1  ;;  %v237_v5 = vld [vmem:[#allocation9 + $0x1f8] sm:$0xff]  ;;  %v234_v6 = vld [vmem:[#allocation9 + $0x1e0] sm:$0xff]  ;;  %s906_s25 = smov [#allocation12]  }
  0x36   :  { %v235_v4 = vld [vmem:[#allocation9 + $0x1e8] sm:$0xff]  ;;  %128 = vmatpush1.msra.mxu0 %v79_v2  ;;  %v236_v7 = vld [vmem:[#allocation9 + $0x1f0] sm:$0xff]  ;;  %v233_v9 = vld [vmem:[#allocation9 + $0x1d8] sm:$0xff]  ;;  %s696_s26 = sshll.u32 %s906_s25, 4  ;;  %s697_s26 = int_to_ptr.vmem [resolvable:$true] %s696_s26 }
  0x37   :  { %324 = vmatprep.subr.mxu1 %v235_v4  ;;  %v231_v8 = vld [vmem:[#allocation9 + $0x1c8] sm:$0xff]  ;;  %707 = vmatmul.mubr.msk.f32.vlgmr.msra.gmra.mxu0 %vm93_vm0, %v78_v3  ;;  %v230_v10 = vld [vmem:[#allocation9 + $0x1c0] sm:$0xff]  ;;  %v232_v11 = vld [vmem:[#allocation9 + $0x1d0] sm:$0xff]  ;;  %s869_s27 = scalar_lea.vmem %s697_s26, 128  ;;  %p874_p7 = scmp.lt.s32.totalorder %s697_s26, %s697_s26 }
  0x38   :  { %395 = vmatprep.subr.mxu0 %v237_v5  ;;  %325 = vmatpush1.msra.mxu1 %v234_v6  ;;  %v227_v12 = vld [vmem:[#allocation9 + $0x1a8] sm:$0xff]  ;;  %v229_v13 = vld [vmem:[#allocation9 + $0x1b8] sm:$0xff]  ;;  %v226_v14 = vld [vmem:[#allocation9 + $0x1a0] sm:$0xff]  ;;  %p870_p6 = scmp.ne.s32.totalorder %s697_s26, %s869_s27  ;;  %p875_p8 = scmp.lt.s32.totalorder %s869_s27, %s869_s27 }
  0x39   :  { %396 = vmatpush1.msra.mxu0 %v236_v7  ;;  %326 = vmatprep.subr.mxu1 %v231_v8  ;;  %v228_v15 = vld [vmem:[#allocation9 + $0x1b0] sm:$0xff]  ;;  %v223_v16 = vld [vmem:[#allocation9 + $0x188] sm:$0xff]  ;;  %v225_v17 = vld [vmem:[#allocation9 + $0x198] sm:$0xff] }
  0x3a   :  { %397 = vmatprep.subr.mxu0 %v233_v9  ;;  %327 = vmatpush1.msra.mxu1 %v230_v10  ;;  %v222_v18 = vld [vmem:[#allocation9 + $0x180] sm:$0xff]  ;;  %v224_v19 = vld [vmem:[#allocation9 + $0x190] sm:$0xff]  ;;  %v219_v20 = vld [vmem:[#allocation9 + $0x168] sm:$0xff]  ;;  %p876_p9 = por %p875_p8, %p874_p7 }
  0x3b   :  { %398 = vmatpush1.msra.mxu0 %v232_v11  ;;  %328 = vmatprep.subr.mxu1 %v227_v12  ;;  %v221_v21 = vld [vmem:[#allocation9 + $0x178] sm:$0xff]  ;;  %v218_v22 = vld [vmem:[#allocation9 + $0x160] sm:$0xff]  ;;  %v220_v23 = vld [vmem:[#allocation9 + $0x170] sm:$0xff] }
  0x3c   :  { %399 = vmatprep.subr.mxu0 %v229_v13  ;;  %329 = vmatpush1.msra.mxu1 %v226_v14  ;;  %v215_v24 = vld [vmem:[#allocation9 + $0x148] sm:$0xff]  ;;  %v217_v25 = vld [vmem:[#allocation9 + $0x158] sm:$0xff]  ;;  %v214_v26 = vld [vmem:[#allocation9 + $0x140] sm:$0xff]  ;;  %p877_p10 = pnand %p876_p9, %p870_p6 }
  0x3d   :  { %400 = vmatpush1.msra.mxu0 %v228_v15  ;;  %330 = vmatprep.subr.mxu1 %v223_v16  ;;  %v216_v27 = vld [vmem:[#allocation9 + $0x150] sm:$0xff]  ;;  %v211_v28 = vld [vmem:[#allocation9 + $0x128] sm:$0xff]  ;;  %v213_v29 = vld [vmem:[#allocation9 + $0x138] sm:$0xff] }
  0x3e   :  { %401 = vmatprep.subr.mxu0 %v225_v17  ;;  %331 = vmatpush1.msra.mxu1 %v222_v18  ;;  %v210_v30 = vld [vmem:[#allocation9 + $0x120] sm:$0xff]  ;;  %v212_v31 = vld [vmem:[#allocation9 + $0x130] sm:$0xff]  ;;  %v207_v32 = vld [vmem:[#allocation9 + $0x108] sm:$0xff] }
  0x3f   :  { %402 = vmatpush1.msra.mxu0 %v224_v19  ;;  %332 = vmatprep.subr.mxu1 %v219_v20  ;;  %v209_v33 = vld [vmem:[#allocation9 + $0x118] sm:$0xff]  ;;  %v206_v34 = vld [vmem:[#allocation9 + $0x100] sm:$0xff]  ;;  %v208_v35 = vld [vmem:[#allocation9 + $0x110] sm:$0xff] }
  0x40   :  { %403 = vmatprep.subr.mxu0 %v221_v21  ;;  %333 = vmatpush1.msra.mxu1 %v218_v22  ;;  %v203_v36 = vld [vmem:[#allocation9 + $0xe8] sm:$0xff]  ;;  %v205_v37 = vld [vmem:[#allocation9 + $0xf8] sm:$0xff]  ;;  %v202_v38 = vld [vmem:[#allocation9 + $0xe0] sm:$0xff] }
  0x41   :  { %404 = vmatpush1.msra.mxu0 %v220_v23  ;;  %334 = vmatprep.subr.mxu1 %v215_v24  ;;  %v204_v39 = vld [vmem:[#allocation9 + $0xf0] sm:$0xff]  ;;  %v199_v40 = vld [vmem:[#allocation9 + $0xc8] sm:$0xff]  ;;  %v201_v41 = vld [vmem:[#allocation9 + $0xd8] sm:$0xff] }
  0x42   :  { %405 = vmatprep.subr.mxu0 %v217_v25  ;;  %335 = vmatpush1.msra.mxu1 %v214_v26  ;;  %v198_v42 = vld [vmem:[#allocation9 + $0xc0] sm:$0xff]  ;;  %v200_v43 = vld [vmem:[#allocation9 + $0xd0] sm:$0xff]  ;;  %v195_v44 = vld [vmem:[#allocation9 + $0xa8] sm:$0xff] }
  0x43   :  { %406 = vmatpush1.msra.mxu0 %v216_v27  ;;  %336 = vmatprep.subr.mxu1 %v211_v28  ;;  %v197_v45 = vld [vmem:[#allocation9 + $0xb8] sm:$0xff]  ;;  %v194_v46 = vld [vmem:[#allocation9 + $0xa0] sm:$0xff]  ;;  %v196_v47 = vld [vmem:[#allocation9 + $0xb0] sm:$0xff] }
  0x44   :  { %407 = vmatprep.subr.mxu0 %v213_v29  ;;  %337 = vmatpush1.msra.mxu1 %v210_v30  ;;  %v191_v48 = vld [vmem:[#allocation9 + $0x88] sm:$0xff]  ;;  %v193_v49 = vld [vmem:[#allocation9 + $0x98] sm:$0xff]  ;;  %v190_v50 = vld [vmem:[#allocation9 + $0x80] sm:$0xff] }
  0x45   :  { %408 = vmatpush1.msra.mxu0 %v212_v31  ;;  %338 = vmatprep.subr.mxu1 %v207_v32  ;;  %v192_v51 = vld [vmem:[#allocation9 + $0x90] sm:$0xff]  ;;  %v187_v52 = vld [vmem:[#allocation9 + $0x68] sm:$0xff]  ;;  %v189_v53 = vld [vmem:[#allocation9 + $0x78] sm:$0xff] }
  0x46   :  { %409 = vmatprep.subr.mxu0 %v209_v33  ;;  %339 = vmatpush1.msra.mxu1 %v206_v34  ;;  %v186_v54 = vld [vmem:[#allocation9 + $0x60] sm:$0xff]  ;;  %v188_v55 = vld [vmem:[#allocation9 + $0x70] sm:$0xff]  ;;  %v183_v56 = vld [vmem:[#allocation9 + $0x48] sm:$0xff] }
  0x47   :  { %410 = vmatpush1.msra.mxu0 %v208_v35  ;;  %340 = vmatprep.subr.mxu1 %v203_v36  ;;  %v185_v57 = vld [vmem:[#allocation9 + $0x58] sm:$0xff]  ;;  %v182_v58 = vld [vmem:[#allocation9 + $0x40] sm:$0xff]  ;;  %v184_v59 = vld [vmem:[#allocation9 + $0x50] sm:$0xff] }
  0x48   :  { %411 = vmatprep.subr.mxu0 %v205_v37  ;;  %341 = vmatpush1.msra.mxu1 %v202_v38  ;;  %v179_v60 = vld [vmem:[#allocation9 + $0x28] sm:$0xff]  ;;  %v181_v61 = vld [vmem:[#allocation9 + $0x38] sm:$0xff]  ;;  %v178_v62 = vld [vmem:[#allocation9 + $0x20] sm:$0xff] }
  0x49   :  { %412 = vmatpush1.msra.mxu0 %v204_v39  ;;  %342 = vmatprep.subr.mxu1 %v199_v40  ;;  %v180_v63 = vld [vmem:[#allocation9 + $0x30] sm:$0xff]  ;;  %v175_v0 = vld [vmem:[#allocation9 + $0x8] sm:$0xff]  ;;  %v177_v1 = vld [vmem:[#allocation9 + $0x18] sm:$0xff] }
  0x4a   :  { %413 = vmatprep.subr.mxu0 %v201_v41  ;;  %343 = vmatpush1.msra.mxu1 %v198_v42  ;;  %v174_v2 = vld [vmem:[#allocation9] sm:$0xff]  ;;  %v176_v3 = vld [vmem:[#allocation9 + $0x10] sm:$0xff]  ;;  %v299_v4 = vld [vmem:[#allocation9 + $0x3e8] sm:$0xff] }
  0x4b   :  { %414 = vmatpush1.msra.mxu0 %v200_v43  ;;  %344 = vmatprep.subr.mxu1 %v195_v44  ;;  %v301_v5 = vld [vmem:[#allocation9 + $0x3f8] sm:$0xff]  ;;  %v298_v6 = vld [vmem:[#allocation9 + $0x3e0] sm:$0xff]  ;;  %v300_v7 = vld [vmem:[#allocation9 + $0x3f0] sm:$0xff] }
  0x4c   :  { %415 = vmatprep.subr.mxu0 %v197_v45  ;;  %345 = vmatpush1.msra.mxu1 %v194_v46  ;;  %v295_v8 = vld [vmem:[#allocation9 + $0x3c8] sm:$0xff]  ;;  %v297_v9 = vld [vmem:[#allocation9 + $0x3d8] sm:$0xff]  ;;  %v294_v10 = vld [vmem:[#allocation9 + $0x3c0] sm:$0xff] }
  0x4d   :  { %416 = vmatpush1.msra.mxu0 %v196_v47  ;;  %346 = vmatprep.subr.mxu1 %v191_v48  ;;  %v296_v11 = vld [vmem:[#allocation9 + $0x3d0] sm:$0xff]  ;;  %v291_v12 = vld [vmem:[#allocation9 + $0x3a8] sm:$0xff]  ;;  %v293_v13 = vld [vmem:[#allocation9 + $0x3b8] sm:$0xff] }
  0x4e   :  { %417 = vmatprep.subr.mxu0 %v193_v49  ;;  %347 = vmatpush1.msra.mxu1 %v190_v50  ;;  %v290_v14 = vld [vmem:[#allocation9 + $0x3a0] sm:$0xff]  ;;  %v292_v15 = vld [vmem:[#allocation9 + $0x3b0] sm:$0xff]  ;;  %v287_v16 = vld [vmem:[#allocation9 + $0x388] sm:$0xff] }
  0x4f   :  { %418 = vmatpush1.msra.mxu0 %v192_v51  ;;  %348 = vmatprep.subr.mxu1 %v187_v52  ;;  %v289_v17 = vld [vmem:[#allocation9 + $0x398] sm:$0xff]  ;;  %v286_v18 = vld [vmem:[#allocation9 + $0x380] sm:$0xff]  ;;  %v288_v19 = vld [vmem:[#allocation9 + $0x390] sm:$0xff] }
  0x50   :  { %419 = vmatprep.subr.mxu0 %v189_v53  ;;  %349 = vmatpush1.msra.mxu1 %v186_v54  ;;  %v283_v20 = vld [vmem:[#allocation9 + $0x368] sm:$0xff]  ;;  %v285_v21 = vld [vmem:[#allocation9 + $0x378] sm:$0xff]  ;;  %v282_v22 = vld [vmem:[#allocation9 + $0x360] sm:$0xff] }
  0x51   :  { %420 = vmatpush1.msra.mxu0 %v188_v55  ;;  %350 = vmatprep.subr.mxu1 %v183_v56  ;;  %v284_v23 = vld [vmem:[#allocation9 + $0x370] sm:$0xff]  ;;  %v279_v24 = vld [vmem:[#allocation9 + $0x348] sm:$0xff]  ;;  %v281_v25 = vld [vmem:[#allocation9 + $0x358] sm:$0xff] }
  0x52   :  { %421 = vmatprep.subr.mxu0 %v185_v57  ;;  %351 = vmatpush1.msra.mxu1 %v182_v58  ;;  %v278_v26 = vld [vmem:[#allocation9 + $0x340] sm:$0xff]  ;;  %v280_v27 = vld [vmem:[#allocation9 + $0x350] sm:$0xff]  ;;  %v275_v28 = vld [vmem:[#allocation9 + $0x328] sm:$0xff] }
  0x53   :  { %422 = vmatpush1.msra.mxu0 %v184_v59  ;;  %352 = vmatprep.subr.mxu1 %v179_v60  ;;  %v277_v29 = vld [vmem:[#allocation9 + $0x338] sm:$0xff]  ;;  %v274_v30 = vld [vmem:[#allocation9 + $0x320] sm:$0xff]  ;;  %v276_v31 = vld [vmem:[#allocation9 + $0x330] sm:$0xff] }
  0x54   :  { %423 = vmatprep.subr.mxu0 %v181_v61  ;;  %353 = vmatpush1.msra.mxu1 %v178_v62  ;;  %v271_v32 = vld [vmem:[#allocation9 + $0x308] sm:$0xff]  ;;  %v273_v33 = vld [vmem:[#allocation9 + $0x318] sm:$0xff]  ;;  %v270_v34 = vld [vmem:[#allocation9 + $0x300] sm:$0xff] }
  0x55   :  { %424 = vmatpush1.msra.mxu0 %v180_v63  ;;  %354 = vmatprep.subr.mxu1 %v175_v0  ;;  %v272_v35 = vld [vmem:[#allocation9 + $0x310] sm:$0xff]  ;;  %v267_v36 = vld [vmem:[#allocation9 + $0x2e8] sm:$0xff]  ;;  %v269_v37 = vld [vmem:[#allocation9 + $0x2f8] sm:$0xff] }
  0x56   :  { %425 = vmatprep.subr.mxu0 %v177_v1  ;;  %355 = vmatpush1.msra.mxu1 %v174_v2  ;;  %v266_v38 = vld [vmem:[#allocation9 + $0x2e0] sm:$0xff]  ;;  %v268_v39 = vld [vmem:[#allocation9 + $0x2f0] sm:$0xff]  ;;  %v263_v40 = vld [vmem:[#allocation9 + $0x2c8] sm:$0xff] }
  0x57   :  { %426 = vmatpush1.msra.mxu0 %v176_v3  ;;  %356 = vmatprep.subr.mxu1 %v299_v4  ;;  %v265_v41 = vld [vmem:[#allocation9 + $0x2d8] sm:$0xff]  ;;  %v262_v42 = vld [vmem:[#allocation9 + $0x2c0] sm:$0xff]  ;;  %v264_v43 = vld [vmem:[#allocation9 + $0x2d0] sm:$0xff] }
  0x58   :  { %427 = vmatprep.subr.mxu0 %v301_v5  ;;  %357 = vmatpush2.msra.mxu1 %v298_v6  ;;  %v259_v44 = vld [vmem:[#allocation9 + $0x2a8] sm:$0xff]  ;;  %v261_v45 = vld [vmem:[#allocation9 + $0x2b8] sm:$0xff]  ;;  %v258_v46 = vld [vmem:[#allocation9 + $0x2a0] sm:$0xff]  ;;  %v83_v6 = vlaneseq }
  0x59   :  { %428 = vmatpush2.msra.mxu0 %v300_v7  ;;  %358 = vmatprep.subr.mxu1 %v295_v8  ;;  %v260_v47 = vld [vmem:[#allocation9 + $0x2b0] sm:$0xff]  ;;  %v255_v48 = vld [vmem:[#allocation9 + $0x288] sm:$0xff]  ;;  %v257_v49 = vld [vmem:[#allocation9 + $0x298] sm:$0xff] }
  0x5a   :  { %429 = vmatprep.subr.mxu0 %v297_v9  ;;  %359 = vmatpush2.msra.mxu1 %v294_v10  ;;  %v254_v50 = vld [vmem:[#allocation9 + $0x280] sm:$0xff]  ;;  %v256_v51 = vld [vmem:[#allocation9 + $0x290] sm:$0xff]  ;;  %v251_v52 = vld [vmem:[#allocation9 + $0x268] sm:$0xff]  ;;  %v959_v7 = vshrl.u32 %v83_v6, 7 }
  0x5b   :  { %430 = vmatpush2.msra.mxu0 %v296_v11  ;;  %360 = vmatprep.subr.mxu1 %v291_v12  ;;  %v253_v53 = vld [vmem:[#allocation9 + $0x278] sm:$0xff]  ;;  %v250_v54 = vld [vmem:[#allocation9 + $0x260] sm:$0xff]  ;;  %v252_v55 = vld [vmem:[#allocation9 + $0x270] sm:$0xff] }
  0x5c   :  { %431 = vmatprep.subr.mxu0 %v293_v13  ;;  %361 = vmatpush2.msra.mxu1 %v290_v14  ;;  %v247_v56 = vld [vmem:[#allocation9 + $0x248] sm:$0xff]  ;;  %v249_v57 = vld [vmem:[#allocation9 + $0x258] sm:$0xff]  ;;  %v246_v58 = vld [vmem:[#allocation9 + $0x240] sm:$0xff]  ;;  %v85_v8 = vsub.s32 0, %v959_v7  ;;  %v89_v10 = vsub.s32 1, %v959_v7 }
  0x5d   :  { %432 = vmatpush2.msra.mxu0 %v292_v15  ;;  %362 = vmatprep.subr.mxu1 %v287_v16  ;;  %v248_v59 = vld [vmem:[#allocation9 + $0x250] sm:$0xff]  ;;  %v243_v60 = vld [vmem:[#allocation9 + $0x228] sm:$0xff]  ;;  %v245_v61 = vld [vmem:[#allocation9 + $0x238] sm:$0xff] }
  0x5e   :  { %433 = vmatprep.subr.mxu0 %v289_v17  ;;  %363 = vmatpush2.msra.mxu1 %v286_v18  ;;  %v242_v62 = vld [vmem:[#allocation9 + $0x220] sm:$0xff]  ;;  %v244_v63 = vld [vmem:[#allocation9 + $0x230] sm:$0xff]  ;;  %v239_v0 = vld [vmem:[#allocation9 + $0x208] sm:$0xff] }
  0x5f   :  { %434 = vmatpush2.msra.mxu0 %v288_v19  ;;  %364 = vmatprep.subr.mxu1 %v283_v20  ;;  %v241_v1 = vld [vmem:[#allocation9 + $0x218] sm:$0xff]  ;;  %v238_v2 = vld [vmem:[#allocation9 + $0x200] sm:$0xff]  ;;  %v240_v3 = vld [vmem:[#allocation9 + $0x210] sm:$0xff] }
  0x60   :  { %435 = vmatprep.subr.mxu0 %v285_v21  ;;  %365 = vmatpush2.msra.mxu1 %v282_v22  ;;  %v509_v4 = vld [vmem:[#allocation10 + $0xf8] sm:$0xff]  ;;  %v81_v9 = vld [vmem:[%s987_s2] sm:$0x3]  ;;  %v508_v21 = vld [vmem:[#allocation10 + $0xf0] sm:$0xff] }
  0x61   :  { %436 = vmatpush2.msra.mxu0 %v284_v23  ;;  %366 = vmatprep.subr.mxu1 %v279_v24  ;;  %v541_v5 = vld [vmem:[#allocation10 + $0x1f8] sm:$0xff]  ;;  %v86_v11 = vrot.slane %v81_v9, %v85_v8  ;;  %v90_v12 = vrot.slane %v81_v9, %v89_v10  ;;  %v540_v22 = vld [vmem:[#allocation10 + $0x1f0] sm:$0xff] }
  0x62   :  { %437 = vmatprep.subr.mxu0 %v281_v25  ;;  %367 = vmatpush2.msra.mxu1 %v278_v26  ;;  %v493_v19 = vld [vmem:[#allocation10 + $0x78] sm:$0xff]  ;;  %v492_v23 = vld [vmem:[#allocation10 + $0x70] sm:$0xff]  ;;  %v507_v25 = vld [vmem:[#allocation10 + $0xe8] sm:$0xff] }
  0x63   :  { %438 = vmatpush2.msra.mxu0 %v280_v27  ;;  %368 = vmatprep.subr.mxu1 %v275_v28  ;;  %v525_v20 = vld [vmem:[#allocation10 + $0x178] sm:$0xff]  ;;  %v524_v24 = vld [vmem:[#allocation10 + $0x170] sm:$0xff]  ;;  %v539_v26 = vld [vmem:[#allocation10 + $0x1e8] sm:$0xff] }
  0x64   :  { %439 = vmatprep.subr.mxu0 %v277_v29  ;;  %369 = vmatpush2.msra.mxu1 %v274_v30  ;;  %v491_v27 = vld [vmem:[#allocation10 + $0x68] sm:$0xff]  ;;  %v506_v29 = vld [vmem:[#allocation10 + $0xe0] sm:$0xff]  ;;  %v528_v6 = vld [vmem:[#allocation10 + $0x190] sm:$0xff] }
  0x65   :  { %440 = vmatpush2.msra.mxu0 %v276_v31  ;;  %370 = vmatprep.subr.mxu1 %v271_v32  ;;  %v523_v28 = vld [vmem:[#allocation10 + $0x168] sm:$0xff]  ;;  %v538_v30 = vld [vmem:[#allocation10 + $0x1e0] sm:$0xff]  ;;  %v480_v9 = vld [vmem:[#allocation10 + $0x10] sm:$0xff] }
  0x66   :  { %441 = vmatprep.subr.mxu0 %v273_v33  ;;  %371 = vmatpush2.msra.mxu1 %v270_v34  ;;  %v490_v31 = vld [vmem:[#allocation10 + $0x60] sm:$0xff]  ;;  %v505_v33 = vld [vmem:[#allocation10 + $0xd8] sm:$0xff] }
  0x67   :  { %442 = vmatpush2.msra.mxu0 %v272_v35  ;;  %372 = vmatprep.subr.mxu1 %v267_v36  ;;  %v522_v32 = vld [vmem:[#allocation10 + $0x160] sm:$0xff]  ;;  %v537_v34 = vld [vmem:[#allocation10 + $0x1d8] sm:$0xff] }
  0x68   :  { %443 = vmatprep.subr.mxu0 %v269_v37  ;;  %373 = vmatpush2.msra.mxu1 %v266_v38  ;;  %v489_v35 = vld [vmem:[#allocation10 + $0x58] sm:$0xff]  ;;  %v504_v37 = vld [vmem:[#allocation10 + $0xd0] sm:$0xff] }
  0x69   :  { %444 = vmatpush2.msra.mxu0 %v268_v39  ;;  %374 = vmatprep.subr.mxu1 %v263_v40  ;;  %v521_v36 = vld [vmem:[#allocation10 + $0x158] sm:$0xff]  ;;  %v536_v38 = vld [vmem:[#allocation10 + $0x1d0] sm:$0xff] }
  0x6a   :  { %445 = vmatprep.subr.mxu0 %v265_v41  ;;  %375 = vmatpush2.msra.mxu1 %v262_v42  ;;  %v488_v39 = vld [vmem:[#allocation10 + $0x50] sm:$0xff]  ;;  %v503_v41 = vld [vmem:[#allocation10 + $0xc8] sm:$0xff] }
  0x6b   :  { %446 = vmatpush2.msra.mxu0 %v264_v43  ;;  %376 = vmatprep.subr.mxu1 %v259_v44  ;;  %v520_v40 = vld [vmem:[#allocation10 + $0x150] sm:$0xff]  ;;  %v535_v42 = vld [vmem:[#allocation10 + $0x1c8] sm:$0xff] }
  0x6c   :  { %447 = vmatprep.subr.mxu0 %v261_v45  ;;  %377 = vmatpush2.msra.mxu1 %v258_v46  ;;  %v487_v43 = vld [vmem:[#allocation10 + $0x48] sm:$0xff]  ;;  %v502_v45 = vld [vmem:[#allocation10 + $0xc0] sm:$0xff] }
  0x6d   :  { %448 = vmatpush2.msra.mxu0 %v260_v47  ;;  %378 = vmatprep.subr.mxu1 %v255_v48  ;;  %v519_v44 = vld [vmem:[#allocation10 + $0x148] sm:$0xff]  ;;  %v534_v46 = vld [vmem:[#allocation10 + $0x1c0] sm:$0xff] }
  0x6e   :  { %449 = vmatprep.subr.mxu0 %v257_v49  ;;  %379 = vmatpush2.msra.mxu1 %v254_v50  ;;  %v486_v47 = vld [vmem:[#allocation10 + $0x40] sm:$0xff]  ;;  %v501_v49 = vld [vmem:[#allocation10 + $0xb8] sm:$0xff] }
  0x6f   :  { %450 = vmatpush2.msra.mxu0 %v256_v51  ;;  %380 = vmatprep.subr.mxu1 %v251_v52  ;;  %v518_v48 = vld [vmem:[#allocation10 + $0x140] sm:$0xff]  ;;  %v533_v50 = vld [vmem:[#allocation10 + $0x1b8] sm:$0xff] }
  0x70   :  { %451 = vmatprep.subr.mxu0 %v253_v53  ;;  %381 = vmatpush2.msra.mxu1 %v250_v54  ;;  %v485_v51 = vld [vmem:[#allocation10 + $0x38] sm:$0xff]  ;;  %v500_v53 = vld [vmem:[#allocation10 + $0xb0] sm:$0xff] }
  0x71   :  { %452 = vmatpush2.msra.mxu0 %v252_v55  ;;  %382 = vmatprep.subr.mxu1 %v247_v56  ;;  %v517_v52 = vld [vmem:[#allocation10 + $0x138] sm:$0xff]  ;;  %v532_v54 = vld [vmem:[#allocation10 + $0x1b0] sm:$0xff] }
  0x72   :  { %453 = vmatprep.subr.mxu0 %v249_v57  ;;  %383 = vmatpush2.msra.mxu1 %v246_v58  ;;  %v484_v55 = vld [vmem:[#allocation10 + $0x30] sm:$0xff]  ;;  %v499_v57 = vld [vmem:[#allocation10 + $0xa8] sm:$0xff] }
  0x73   :  { %454 = vmatpush2.msra.mxu0 %v248_v59  ;;  %384 = vmatprep.subr.mxu1 %v243_v60  ;;  %v516_v56 = vld [vmem:[#allocation10 + $0x130] sm:$0xff]  ;;  %v531_v58 = vld [vmem:[#allocation10 + $0x1a8] sm:$0xff] }
  0x74   :  { %455 = vmatprep.subr.mxu0 %v245_v61  ;;  %385 = vmatpush2.msra.mxu1 %v242_v62  ;;  %v483_v59 = vld [vmem:[#allocation10 + $0x28] sm:$0xff]  ;;  %v498_v61 = vld [vmem:[#allocation10 + $0xa0] sm:$0xff] }
  0x75   :  { %456 = vmatpush2.msra.mxu0 %v244_v63  ;;  %386 = vmatprep.subr.mxu1 %v239_v0  ;;  %v515_v60 = vld [vmem:[#allocation10 + $0x128] sm:$0xff]  ;;  %v530_v62 = vld [vmem:[#allocation10 + $0x1a0] sm:$0xff] }
  0x76   :  { %457 = vmatprep.subr.mxu0 %v241_v1  ;;  %387 = vmatpush2.msra.mxu1 %v238_v2  ;;  %v482_v63 = vld [vmem:[#allocation10 + $0x20] sm:$0xff]  ;;  %v497_v1 = vld [vmem:[#allocation10 + $0x98] sm:$0xff] }
  0x77   :  { %458 = vmatpush2.msra.mxu0 %v240_v3  ;;  %709 = vmatprep.subr.mxu1 %v509_v4  ;;  %v514_v0 = vld [vmem:[#allocation10 + $0x120] sm:$0xff]  ;;  %v529_v2 = vld [vmem:[#allocation10 + $0x198] sm:$0xff] }
  0x78   :  { %744 = vmatprep.subr.mxu0 %v541_v5  ;;  %v481_v3 = vld [vmem:[#allocation10 + $0x18] sm:$0xff]  ;;  %v496_v5 = vld [vmem:[#allocation10 + $0x90] sm:$0xff] }
  0x79   :  { %v513_v4 = vld [vmem:[#allocation10 + $0x118] sm:$0xff] }
  0xf7   :  { %v163_v13 = vpop.f32.mrf.mxu0 }
  0xf8   :  { %v164_v14 = vadd.f32 %v163_v13, %v86_v11  ;;  %v512_v11 = vld [vmem:[#allocation10 + $0x110] sm:$0xff]  ;;  %v527_v13 = vld [vmem:[#allocation10 + $0x188] sm:$0xff] }
  0xf9   :  { %v165_v15 = vpop.f32.mrf.mxu0 }
  0xfa   :  { %v166_v16 = vadd.f32 %v165_v15, %v90_v12  ;;  %v168_v18 = vmax.f32 %v164_v14, 0.0  ;;  %v495_v12 = vld [vmem:[#allocation10 + $0x88] sm:$0xff] }
  0xfb   :  { %v479_v14 = vld [vmem:[#allocation10 + $0x8] sm:$0xff] }
  0xfc   :  { %v169_v17 = vmax.f32 %v166_v16, 0.0  ;;  %v511_v15 = vld [vmem:[#allocation10 + $0x108] sm:$0xff]  ;;  %v494_v16 = vld [vmem:[#allocation10 + $0x80] sm:$0xff] }
  0xfe   :  { %388 = vmatprep.mubr.f32.mxu1 %v169_v17  ;;  %459 = vmatprep.mubr.f32.mxu0 %v169_v17  ;;  %v526_v17 = vld [vmem:[#allocation10 + $0x180] sm:$0xff] }
  0xff   :  { %389 = vmatmul.mubr.f32.vlgmr.msra.gmra.mxu1 %v168_v18  ;;  %460 = vmatmul.mubr.f32.vlgmr.msra.gmra.mxu0 %v168_v18  ;;  %v478_v18 = vld [vmem:[#allocation10] sm:$0xff] }
 0x100   :  { %710 = vmatpush3.msra.mxu1 %v493_v19  ;;  %745 = vmatpush3.msra.mxu0 %v525_v20  ;;  %v510_v19 = vld [vmem:[#allocation10 + $0x100] sm:$0xff]  ;;  %v314_v20 = vsub.s32 2, %v959_v7 }
 0x101   :  { %711 = vmatprep.subr.mxu1 %v508_v21  ;;  %746 = vmatprep.subr.mxu0 %v540_v22  ;;  %v302_v21 = vld [vmem:[%s989_s4] sm:$0xf]  ;;  %v318_v22 = vsub.s32 3, %v959_v7 }
 0x102   :  { %712 = vmatpush3.msra.mxu1 %v492_v23  ;;  %747 = vmatpush3.msra.mxu0 %v524_v24  ;;  %v307_v23 = vrot.slane %v302_v21, %v85_v8  ;;  %v315_v24 = vrot.slane %v302_v21, %v314_v20 }
 0x103   :  { %713 = vmatprep.subr.mxu1 %v507_v25  ;;  %748 = vmatprep.subr.mxu0 %v539_v26  ;;  %v311_v25 = vrot.slane %v302_v21, %v89_v10  ;;  %v319_v26 = vrot.slane %v302_v21, %v318_v22  ;;  %v708_v10 = vld [vmem:[%s991_s6] ss:$0 sm:$0xff] }
 0x104   :  { %714 = vmatpush3.msra.mxu1 %v491_v27  ;;  %749 = vmatpush3.msra.mxu0 %v523_v28 }
 0x105   :  { %715 = vmatprep.subr.mxu1 %v506_v29  ;;  %750 = vmatprep.subr.mxu0 %v538_v30 }
 0x106   :  { %716 = vmatpush3.msra.mxu1 %v490_v31  ;;  %751 = vmatpush3.msra.mxu0 %v522_v32 }
 0x107   :  { %717 = vmatprep.subr.mxu1 %v505_v33  ;;  %752 = vmatprep.subr.mxu0 %v537_v34 }
 0x108   :  { %718 = vmatpush3.msra.mxu1 %v489_v35  ;;  %753 = vmatpush3.msra.mxu0 %v521_v36 }
 0x109   :  { %719 = vmatprep.subr.mxu1 %v504_v37  ;;  %754 = vmatprep.subr.mxu0 %v536_v38 }
 0x10a   :  { %720 = vmatpush3.msra.mxu1 %v488_v39  ;;  %755 = vmatpush3.msra.mxu0 %v520_v40 }
 0x10b   :  { %721 = vmatprep.subr.mxu1 %v503_v41  ;;  %756 = vmatprep.subr.mxu0 %v535_v42 }
 0x10c   :  { %722 = vmatpush3.msra.mxu1 %v487_v43  ;;  %757 = vmatpush3.msra.mxu0 %v519_v44 }
 0x10d   :  { %723 = vmatprep.subr.mxu1 %v502_v45  ;;  %758 = vmatprep.subr.mxu0 %v534_v46 }
 0x10e   :  { %724 = vmatpush3.msra.mxu1 %v486_v47  ;;  %759 = vmatpush3.msra.mxu0 %v518_v48 }
 0x10f   :  { %725 = vmatprep.subr.mxu1 %v501_v49  ;;  %760 = vmatprep.subr.mxu0 %v533_v50 }
 0x110   :  { %726 = vmatpush3.msra.mxu1 %v485_v51  ;;  %761 = vmatpush3.msra.mxu0 %v517_v52 }
 0x111   :  { %727 = vmatprep.subr.mxu1 %v500_v53  ;;  %762 = vmatprep.subr.mxu0 %v532_v54 }
 0x112   :  { %728 = vmatpush3.msra.mxu1 %v484_v55  ;;  %763 = vmatpush3.msra.mxu0 %v516_v56 }
 0x113   :  { %729 = vmatprep.subr.mxu1 %v499_v57  ;;  %764 = vmatprep.subr.mxu0 %v531_v58 }
 0x114   :  { %730 = vmatpush3.msra.mxu1 %v483_v59  ;;  %765 = vmatpush3.msra.mxu0 %v515_v60 }
 0x115   :  { %731 = vmatprep.subr.mxu1 %v498_v61  ;;  %766 = vmatprep.subr.mxu0 %v530_v62 }
 0x116   :  { %732 = vmatpush3.msra.mxu1 %v482_v63  ;;  %767 = vmatpush3.msra.mxu0 %v514_v0 }
 0x117   :  { %733 = vmatprep.subr.mxu1 %v497_v1  ;;  %768 = vmatprep.subr.mxu0 %v529_v2 }
 0x118   :  { %734 = vmatpush3.msra.mxu1 %v481_v3  ;;  %769 = vmatpush3.msra.mxu0 %v513_v4 }
 0x119   :  { %735 = vmatprep.subr.mxu1 %v496_v5  ;;  %770 = vmatprep.subr.mxu0 %v528_v6 }
 0x11a   :  { %736 = vmatpush3.msra.mxu1 %v480_v9  ;;  %771 = vmatpush3.msra.mxu0 %v512_v11 }
 0x11b   :  { %737 = vmatprep.subr.mxu1 %v495_v12  ;;  %772 = vmatprep.subr.mxu0 %v527_v13 }
 0x11c   :  { %738 = vmatpush3.msra.mxu1 %v479_v14  ;;  %773 = vmatpush3.msra.mxu0 %v511_v15 }
 0x11d   :  { %739 = vmatprep.subr.mxu1 %v494_v16  ;;  %774 = vmatprep.subr.mxu0 %v526_v17 }
 0x11e   :  { %740 = vmatpush3.msra.mxu1 %v478_v18  ;;  %775 = vmatpush3.msra.mxu0 %v510_v19 }
 0x1bf   :  { %v390_v27 = vpop.f32.mrf.mxu1  ;;  %v461_v28 = vpop.f32.mrf.mxu0 }
 0x1c0   :  { %v391_v29 = vadd.f32 %v390_v27, %v307_v23  ;;  %v462_v30 = vadd.f32 %v461_v28, %v315_v24 }
 0x1c1   :  { %v392_v31 = vpop.f32.mrf.mxu1  ;;  %v463_v32 = vpop.f32.mrf.mxu0 }
 0x1c2   :  { %v393_v33 = vadd.f32 %v392_v31, %v311_v25  ;;  %v464_v34 = vadd.f32 %v463_v32, %v319_v26  ;;  %v466_v37 = vmax.f32 %v391_v29, 0.0  ;;  %v468_v38 = vmax.f32 %v462_v30, 0.0 }
 0x1c4   :  { %v467_v35 = vmax.f32 %v393_v33, 0.0  ;;  %v469_v36 = vmax.f32 %v464_v34, 0.0 }
 0x1c6   :  { %613 = vmatprep.mubr.f32.mxu1 %v467_v35  ;;  %683 = vmatprep.mubr.f32.mxu0 %v469_v36 }
 0x1c7   :  { %614 = vmatmul.mubr.f32.vlgmr.msra.gmra.mxu1 %v466_v37  ;;  %684 = vmatmul.mubr.f32.vlgmr.msra.gmra.mxu0 %v468_v38 }
 0x287   :  { %v741_v8 = vpop.f32.mrf.mxu1  ;;  %v776_v7 = vpop.f32.mrf.mxu0 }
 0x289   :  { %v742_v39 = vpop.f32.mrf.mxu1  ;;  %v777_v40 = vpop.f32.mrf.mxu0 }
 0x28a   :  { %v743_v41 = vadd.f32 %v742_v39, %v741_v8  ;;  %v778_v43 = vadd.f32 %v777_v40, %v776_v7 }
 0x28c   :  { %v616_v42 = vadd.f32 %v743_v41, %v708_v10 }
 0x28e   :  { %v686_v44 = vadd.f32 %v778_v43, %v616_v42 }
 0x290   :  { %689 = vst [vmem:[#allocation12] sm:$0xff] %v686_v44 }
 0x291   :  { %880 = shalt.err (!%p877_p10)
}
 0x292   :  { %699 = dma.vmem_to_hbm [thread:$0]  %s697_s26, 128, %s992_s7, [#allocation6]  }
 0x293   :  { %895 = dma.done.wait [#allocation6], 128  }
 0x294   :  { %896 = vsyncadd [#allocation6], 4294967168 }
 0x295   :  { %703 = vsyncpa [#allocation5], 1 }
 0x296   :  { %704 = vsyncpa [#allocation8], 1 }
 0x297   :  { %705 = vsyncpa [#allocation11], 1 }
 0x298   :  { %706 = vsyncpa [#allocation6], 1 }

</bundles_post_ra>
